<compile_context>
chip_gen: v5e
topology: v5e:2x2
jax: 0.10.0
libtpu: 0.0.40
codegen_flags: <defaults>
</compile_context>

<pallas_src>
import functools
import math

import jax
import jax.numpy as jnp
from jax.experimental import pallas as pl
from jax.experimental.pallas import tpu as pltpu


def _round_up(x, m):
    return ((x + m - 1) // m) * m


def _dense_stack_kernel(*refs, num_layers, compute_dtype, elementwise_dtype):
    """refs = (x_ref, w0, b0, ..., w_{L-1}, b_{L-1}, o_ref); one row tile per step.

    All layers are applied back-to-back in VMEM/vregs; the activation never
    round-trips through HBM between layers.
    """
    x_ref = refs[0]
    o_ref = refs[-1]
    # Cast to the MXU storage dtype inside the kernel (VMEM-only, no extra
    # HBM pass in the wrapper).
    h = x_ref[...].astype(compute_dtype)
    for l in range(num_layers):                                   # static unroll
        w_ref = refs[1 + 2 * l]
        b_ref = refs[2 + 2 * l]
        y = jnp.dot(h, w_ref[...], preferred_element_type=jnp.float32)   # MXU, f32 acc
        y = y.astype(elementwise_dtype) + b_ref[...].astype(elementwise_dtype)
        h = jnp.tanh(y)                                           # VPU/EUP
        if l + 1 < num_layers:
            h = h.astype(compute_dtype)                           # bf16 for next MXU pass
    o_ref[...] = h.astype(o_ref.dtype)


def prepare_dense_params(params, storage_dtype=jnp.bfloat16):
    """One-time conversion of (W[in,out], b[out]) params for the kernel.

    Weights are cast to the bf16 storage dtype once (outside the per-call
    path); biases are kept in f32 as a [1, out] row for broadcasting.
    """
    prepared = []
    for w, b in params:
        prepared.append((jnp.asarray(w, storage_dtype),
                         jnp.asarray(b, jnp.float32).reshape(1, -1)))
    return prepared


def dense_layer_forward(x, prepared_params, *, tile_m=2048,
                        out_dtype=jnp.bfloat16,
                        elementwise_dtype=jnp.float32,
                        weight_buffering=None):
    """x: [..., in_dim] -> [..., sizes[-1]] (out_dtype); h = tanh(h @ W + b) per layer.

    prepared_params : output of prepare_dense_params.
    elementwise_dtype: f32 is safe on all generations; use jnp.bfloat16 on
      v6e/v7x (bf16 VPU/EUP paths).
    weight_buffering : pass pl.Buffered(1) on v7x when weights are MiB-scale so
      the resident weights are single-buffered (halves their VMEM footprint).
    """
    lead = x.shape[:-1]
    in_dim = x.shape[-1]
    M = int(math.prod(lead)) if lead else 1
    out_dim = prepared_params[-1][0].shape[1]
    compute_dtype = prepared_params[0][0].dtype

    x2d = x.reshape(M, in_dim)                     # metadata-only

    # Row tiling: biggest tile that fits, but always >=2 grid steps when
    # possible so v7x's two TensorCores both get work on the "parallel" axis.
    TM = max(8, min(_round_up(tile_m, 8), _round_up(M, 8)))
    if pl.cdiv(M, TM) < 2 and M > 8:
        TM = _round_up(pl.cdiv(M, 2), 8)
    grid = (pl.cdiv(M, TM),)

    wb_kwargs = {} if weight_buffering is None else {"pipeline_mode": weight_buffering}

    in_specs = [pl.BlockSpec((TM, in_dim), lambda i: (i, 0))]
    flat_inputs = [x2d]
    for w, b in prepared_params:
        k, n = w.shape
        # Constant index_map => weights/biases DMA'd once, VMEM-resident across
        # all row tiles.
        in_specs.append(pl.BlockSpec((k, n), lambda i: (0, 0), **wb_kwargs))
        in_specs.append(pl.BlockSpec((1, n), lambda i: (0, 0), **wb_kwargs))
        flat_inputs += [w, b]

    # HBM traffic / flop hints for the XLA scheduler.
    param_bytes = sum(w.size * w.dtype.itemsize + b.size * b.dtype.itemsize
                      for w, b in prepared_params)
    bytes_accessed = (M * in_dim * x.dtype.itemsize
                      + param_bytes
                      + M * out_dim * jnp.dtype(out_dtype).itemsize)
    flops = 2 * M * sum(w.shape[0] * w.shape[1] for w, _ in prepared_params)
    transcendentals = M * sum(w.shape[1] for w, _ in prepared_params)

    # Explicit VMEM budget (v7x: 64 MiB/TC): double-buffered activation blocks
    # + resident params + f32 intermediate headroom for the widest layer.
    max_feat = max([in_dim] + [w.shape[1] for w, _ in prepared_params])
    vmem_est = (2 * TM * in_dim * x.dtype.itemsize
                + 2 * TM * out_dim * jnp.dtype(out_dtype).itemsize
                + 2 * param_bytes
                + 4 * TM * max_feat * 4)
    vmem_limit = int(min(max(vmem_est, 16 * 1024 * 1024), 64 * 1024 * 1024))

    out = pl.pallas_call(
        functools.partial(_dense_stack_kernel,
                          num_layers=len(prepared_params),
                          compute_dtype=compute_dtype,
                          elementwise_dtype=elementwise_dtype),
        out_shape=jax.ShapeDtypeStruct((M, out_dim), out_dtype),
        grid=grid,
        in_specs=in_specs,
        # Narrow output written straight from the kernel (block last dim equals
        # the full array dim) => no separate out[:, :out_dim] slice pass.
        out_specs=pl.BlockSpec((TM, out_dim), lambda i: (i, 0)),
        compiler_params=pltpu.CompilerParams(
            dimension_semantics=("parallel",),
            vmem_limit_bytes=vmem_limit),
        cost_estimate=pl.CostEstimate(
            flops=int(flops),
            transcendentals=int(transcendentals),
            bytes_accessed=int(bytes_accessed)),
    )(*flat_inputs)

    return out.reshape(lead + (out_dim,))


dense_layer_forward_jit = jax.jit(
    dense_layer_forward,
    static_argnames=("tile_m", "out_dtype", "elementwise_dtype", "weight_buffering"))


def init_dense_layer_params(key, in_dim, sizes):
    """Xavier-uniform (gain=linear=1) weights stored as [in, out].

    Bias is zero-init; torch.nn.Linear's default is uniform(+-1/sqrt(fan_in)),
    kept deterministic/simple here (documented divergence from torch default).
    """
    in_sizes = [in_dim] + list(sizes[:-1])
    params = []
    for in_size, out_size in zip(in_sizes, sizes):
        key, wk = jax.random.split(key)
        bound = math.sqrt(6.0 / (in_size + out_size))
        w = jax.random.uniform(wk, (in_size, out_size), jnp.float32, -bound, bound)
        b = jnp.zeros((out_size,), jnp.float32)
        params.append((w, b))
    return params


if __name__ == "__main__":
    key = jax.random.PRNGKey(0)
    in_dim = 32
    sizes = [32, 32]
    xk, pk = jax.random.split(key)
    # Tacotron-style [batch, time, in_dim]
    x = jax.random.normal(xk, (2, 8, in_dim), jnp.float32)

    params = init_dense_layer_params(pk, in_dim, sizes)
    prepared = prepare_dense_params(params)      # one-time bf16 cast of weights

    out = dense_layer_forward_jit(x, prepared)
    out = jax.block_until_ready(out)

    # Pure-JAX reference with matching bf16 rounding of weights / inter-layer
    # activations (kernel keeps bias-add + tanh in f32; output stored as bf16).
    ref = x
    for (w, b) in params:
        hq = ref.astype(jnp.bfloat16).astype(jnp.float32)
        wq = w.astype(jnp.bfloat16).astype(jnp.float32)
        ref = jnp.tanh(
            jnp.matmul(hq, wq, precision=jax.lax.Precision.HIGHEST) + b)

    assert out.shape == (2, 8, sizes[-1])
    assert out.dtype == jnp.bfloat16
    out_f32 = out.astype(jnp.float32)
    err = float(jnp.max(jnp.abs(out_f32 - ref)))
    assert jnp.allclose(out_f32, ref, atol=2e-2, rtol=2e-2), f"max abs err {err}"

    print("KERNEL_OK")
</pallas_src>

<mosaic_0001>
module attributes {stable_mosaic.version = 11 : i64} {
  func.func @_dense_stack_kernel(%arg0: i32, %arg1: memref<8x32xf32, #tpu.memory_space<vmem>>, %arg2: memref<32x32xbf16, #tpu.memory_space<vmem>>, %arg3: memref<1x32xf32, #tpu.memory_space<vmem>>, %arg4: memref<32x32xbf16, #tpu.memory_space<vmem>>, %arg5: memref<1x32xf32, #tpu.memory_space<vmem>>, %arg6: memref<8x32xbf16, #tpu.memory_space<vmem>>) attributes {dimension_semantics = [#tpu.dimension_semantics<parallel>], iteration_bounds = array<i64: 2>, scalar_prefetch = 0 : i64, scratch_operands = 0 : i64, tpu.core_type = #tpu.core_type<tc>, window_params = [{transform_indices = @transform_0, window_bounds = array<i64: 8, 32>}, {pipeline_mode = #tpu.pipeline_mode<synchronous>, transform_indices = @transform_1, window_bounds = array<i64: 32, 32>}, {pipeline_mode = #tpu.pipeline_mode<synchronous>, transform_indices = @transform_2, window_bounds = array<i64: 1, 32>}, {pipeline_mode = #tpu.pipeline_mode<synchronous>, transform_indices = @transform_3, window_bounds = array<i64: 32, 32>}, {pipeline_mode = #tpu.pipeline_mode<synchronous>, transform_indices = @transform_4, window_bounds = array<i64: 1, 32>}, {transform_indices = @transform_5, window_bounds = array<i64: 8, 32>}]} {
    %c0 = arith.constant 0 : index
    %c0_0 = arith.constant 0 : index
    %0 = vector.load %arg1[%c0, %c0_0] : memref<8x32xf32, #tpu.memory_space<vmem>>, vector<8x32xf32>
    %1 = arith.truncf %0 : vector<8x32xf32> to vector<8x32xbf16>
    %c0_1 = arith.constant 0 : index
    %c0_2 = arith.constant 0 : index
    %2 = vector.load %arg2[%c0_1, %c0_2] : memref<32x32xbf16, #tpu.memory_space<vmem>>, vector<32x32xbf16>
    %cst = arith.constant dense<0.000000e+00> : vector<8x32xf32>
    %3 = tpu.matmul %1, %2, %cst {dimension_numbers = #tpu.dot_dimension_numbers<[1], [0], [0], [1], [0, 0, 1, 1], [], []>} : vector<8x32xbf16>, vector<32x32xbf16>, vector<8x32xf32> -> vector<8x32xf32>
    %c0_3 = arith.constant 0 : index
    %c0_4 = arith.constant 0 : index
    %4 = vector.load %arg3[%c0_3, %c0_4] : memref<1x32xf32, #tpu.memory_space<vmem>>, vector<1x32xf32>
    %5 = vector.broadcast %4 : vector<1x32xf32> to vector<8x32xf32>
    %6 = arith.addf %3, %5 : vector<8x32xf32>
    %7 = math.tanh %6 : vector<8x32xf32>
    %8 = arith.truncf %7 : vector<8x32xf32> to vector<8x32xbf16>
    %c0_5 = arith.constant 0 : index
    %c0_6 = arith.constant 0 : index
    %9 = vector.load %arg4[%c0_5, %c0_6] : memref<32x32xbf16, #tpu.memory_space<vmem>>, vector<32x32xbf16>
    %cst_7 = arith.constant dense<0.000000e+00> : vector<8x32xf32>
    %10 = tpu.matmul %8, %9, %cst_7 {dimension_numbers = #tpu.dot_dimension_numbers<[1], [0], [0], [1], [0, 0, 1, 1], [], []>} : vector<8x32xbf16>, vector<32x32xbf16>, vector<8x32xf32> -> vector<8x32xf32>
    %c0_8 = arith.constant 0 : index
    %c0_9 = arith.constant 0 : index
    %11 = vector.load %arg5[%c0_8, %c0_9] : memref<1x32xf32, #tpu.memory_space<vmem>>, vector<1x32xf32>
    %12 = vector.broadcast %11 : vector<1x32xf32> to vector<8x32xf32>
    %13 = arith.addf %10, %12 : vector<8x32xf32>
    %14 = math.tanh %13 : vector<8x32xf32>
    %15 = arith.truncf %14 : vector<8x32xf32> to vector<8x32xbf16>
    %c0_10 = arith.constant 0 : index
    %c0_11 = arith.constant 0 : index
    %16 = vector.load %arg6[%c0_10, %c0_11] : memref<8x32xbf16, #tpu.memory_space<vmem>>, vector<8x32xbf16>
    tpu.vector_store %arg6[%c0_10, %c0_11], %15 {strides = array<i32>} : memref<8x32xbf16, #tpu.memory_space<vmem>>, vector<8x32xbf16>,
    return
  }
  func.func @transform_0(%arg0: i32) -> (i32, i32) {
    %c0_i32 = arith.constant 0 : i32
    %c0_i32_0 = arith.constant 0 : i32
    return %arg0, %c0_i32 : i32, i32
  }
  func.func @transform_1(%arg0: i32) -> (i32, i32) {
    %c0_i32 = arith.constant 0 : i32
    %c0_i32_0 = arith.constant 0 : i32
    %c0_i32_1 = arith.constant 0 : i32
    return %c0_i32, %c0_i32_0 : i32, i32
  }
  func.func @transform_2(%arg0: i32) -> (i32, i32) {
    %c0_i32 = arith.constant 0 : i32
    %c0_i32_0 = arith.constant 0 : i32
    %c0_i32_1 = arith.constant 0 : i32
    return %c0_i32, %c0_i32_0 : i32, i32
  }
  func.func @transform_3(%arg0: i32) -> (i32, i32) {
    %c0_i32 = arith.constant 0 : i32
    %c0_i32_0 = arith.constant 0 : i32
    %c0_i32_1 = arith.constant 0 : i32
    return %c0_i32, %c0_i32_0 : i32, i32
  }
  func.func @transform_4(%arg0: i32) -> (i32, i32) {
    %c0_i32 = arith.constant 0 : i32
    %c0_i32_0 = arith.constant 0 : i32
    %c0_i32_1 = arith.constant 0 : i32
    return %c0_i32, %c0_i32_0 : i32, i32
  }
  func.func @transform_5(%arg0: i32) -> (i32, i32) {
    %c0_i32 = arith.constant 0 : i32
    %c0_i32_0 = arith.constant 0 : i32
    return %arg0, %c0_i32 : i32, i32
  }
}

</mosaic_0001>

<bundles_post_ra>
// kernel: dense_layer_forward.1
= control target key start
LH: loop header
LB: loop body
LE: loop exit
PB: predicated region body
PF: predicated region fallthrough
CT: control target
= control target key end

     0   :  { %10 = vsyncpa [#allocation3], 0  ;;  %s923_s0 = inlined_call_operand.hbm [shape: f32[16,32], index: 0, kind: input, shape index: {}]   ;;  %s924_s1 = inlined_call_operand.hbm [shape: bf16[32,32], index: 1, kind: input, shape index: {}]   ;;  %s925_s2 = inlined_call_operand.vmem [shape: f32[1,32], index: 2, kind: input, shape index: {}]   ;;  %s926_s3 = inlined_call_operand.hbm [shape: bf16[32,32], index: 3, kind: input, shape index: {}]   ;;  %s927_s4 = inlined_call_operand.vmem [shape: f32[1,32], index: 4, kind: input, shape index: {}]   ;;  %s928_s5 = inlined_call_operand.hbm [shape: bf16[16,32], index: 5, kind: output, shape index: {}]  }
   0x1   :  { %12 = vsyncpa [#allocation3 + $0x1], 0 }
   0x2   :  { %13 = vsyncpa [#allocation6], 0 }
   0x3   :  { %14 = vsyncpa [#allocation4], 0 }
   0x4   :  { %16 = vsyncpa [#allocation4 + $0x1], 0  ;;  %s771_s18 = smov 0   ;;  %s773_s19 = smov 0  }
   0x5   :  { %s775_s20 = smov 0   ;;  %s777_s21 = smov 0  }
   0x6 LB: > { %s174_s24 = sshll.u32 %s924_s1, 4  ;;  %s795_s25 = sadd.s32 4294967295, %s735_s21   ;;  %s735_s21 = sphi %s777_s21, %s939_s21   ;;  %s731_s20 = sphi %s775_s20, %s938_s20   ;;  %s727_s19 = sphi %s773_s19, %s937_s19   ;;  %s723_s18 = sphi %s771_s18, %s936_s18   ;;  %s175_s24 = int_to_ptr.hbm [resolvable:$true] %s174_s24 }
   0x7   : > { %p463_p0 = scmp.ge.s32.totalorder %s735_s21, 1  ;;  %p43_p1 = scmp.eq.s32.totalorder %s795_s25, 0 }
   0x8   : > { %p163_p2 = scmp.lt.s32.totalorder %s735_s21, 3  ;;  %s737_s27 = smov [#allocation5]  }
   0x9   : > { %s176_s28 = sshll.u32 %s737_s27, 4  ;;  %s191_s6 = sshll.u32 %s926_s3, 4  ;;  %s177_s28 = int_to_ptr.vmem [resolvable:$true] %s176_s28  ;;  %s192_s6 = int_to_ptr.hbm [resolvable:$true] %s191_s6 }
   0xa   : > { %p800_p3 = pnand %p463_p0, %p163_p2  ;;  %s738_s7 = smov [#allocation7]  }
   0xb   : > { %s193_s8 = sshll.u32 %s738_s7, 4  ;;  %s739_s9 = smov 64   ;;  %s194_s8 = int_to_ptr.vmem [resolvable:$true] %s193_s8 }
   0xc   : > { %p512_p4 = pneg %p800_p3  ;;  %s740_s10 = smov 4  }
   0xd   : > { %s462_s11 = sadd.s32 4294967294, %s735_s21   ;;  %s814_s12 = sadd.s32 1, %s735_s21  }
   0xe   : > { %p513_p6 = pnand %p512_p4, %p43_p1  ;;  %s26_s13 = ssub.s32 %s735_s21, %s814_s12 }
   0xf   : > { %s29_s14 = sadd.s32 1, %s731_s20  ;;  %p27_p7 = scmp.eq.s32.totalorder %s26_s13, 0 }
  0x10   : > { %515 = dma.hbm_to_vmem [thread:$0]  (!%p513_p6), %s175_s24, 256, %s177_s28, [#allocation6], %s739_s9, %s739_s9, %s740_s10  }
  0x11   : > { %518 = dma.hbm_to_vmem [thread:$0]  (!%p513_p6), %s192_s6, 256, %s194_s8, [#allocation6], %s739_s9, %s739_s9, %s740_s10  }
  0x12   : > { %p36_p8 = scmp.ne.s32.totalorder %s731_s20, %s727_s19  ;;  %p37_p9 = scmp.eq.s32.totalorder %s735_s21, 0 }
  0x13   : > { %p42_p10 = scmp.ne.s32.totalorder %s727_s19, %s723_s18  ;;  %p150_p13 = scmp.eq.s32.totalorder %s795_s25, 1 }
  0x14   : > { %s825_s15 = scalar_select %p27_p7, %s731_s20, %s29_s14  }
  0x15   : > { %p827_p11 = por %p37_p9, %p36_p8  ;;  %p833_p12 = por %p43_p1, %p42_p10 }
  0x16   : > { %p156_p0 = scmp.eq.s32.totalorder %s462_s11, 1  ;;  %p529_p2 = scmp.lt.s32.totalorder %s735_s21, 2 }
  0x17   : > { %s210_s22 = sand.u32 1, %s731_s20   ;;  %p840_p4 = por %p150_p13, %p36_p8 }
  0x18   : > { %p844_p6 = por %p156_p0, %p42_p10  ;;  %s467_s27 = sshll.u32 %s210_s22, 3 }
  0x19   : > { %s468_s28 = sshll.u32 %s735_s21, 3  ;;  %s214_s7 = scalar_lea.vmem [#allocation2], %s467_s27 }
  0x1a   : > { %s218_s6 = scalar_lea.hbm %s923_s0, %s468_s28  ;;  %s222_s8 = sshll.u32 %s214_s7, 4  ;;  %s223_s8 = int_to_ptr.vmem [resolvable:$true] %s222_s8 }
  0x1b   : > { %s220_s9 = sshll.u32 %s218_s6, 4  ;;  %p854_p7 = pnand %p529_p2, %p827_p11  ;;  %s221_s9 = int_to_ptr.hbm [resolvable:$true] %s220_s9 }
  0x1c   : > { %s211_s11 = scalar_lea.sflag [#allocation3], %s210_s22  ;;  %s635_s13 = sshra.s32 %s221_s9, 4  ;;  %s636_s13 = int_to_ptr.hbm [resolvable:$true] %s635_s13 }
  0x1d   : > { %s637_s14 = scalar_lea.hbm %s636_s13, 8  ;;  %p639_p9 = pneg %p854_p7 }
  0x1e   : > { %p638_p8 = scmp.ne.s32.totalorder %s636_s13, %s637_s14  ;;  %s642_s29 = scalar_lea.hbm %s923_s0, 16 }
  0x1f   : > { %p643_p11 = scmp.lt.s32.totalorder %s636_s13, %s923_s0  ;;  %p644_p0 = scmp.lt.s32.totalorder %s642_s29, %s637_s14 }
  0x20   : > { %p640_p10 = pnand %p639_p9, %p638_p8 }
  0x21   : > { %p645_p2 = por %p644_p0, %p643_p11 }
  0x22   : > { %p641_p13 = pneg %p640_p10 }
  0x24   : > { %p646_p5 = pnand %p645_p2, %p641_p13 }
  0x26   : > { %649 = shalt.err (!%p646_p5)
}
  0x27   : > { %522 = dma.hbm_to_vmem [thread:$0]  (!%p854_p7), %s221_s9, 128, %s223_s8, %s211_s11  }
  0x28   : > { %231 = sbr.rel (%p800_p3) target bundleno = 333 (0x14d), region = 40  ;;  %s871_s22 = sand.u32 (!%p800_p3), 1, %s727_s19  }
  0x29   : > { %s470_s6 = sshll.u32 (!%p800_p3), %s871_s22, 3  ;;  %s234_s7 = scalar_lea.sflag (!%p800_p3), [#allocation3], %s871_s22 }
  0x2a   : > { %s237_s27 = scalar_lea.vmem (!%p800_p3), [#allocation2], %s470_s6 }
  0x2d   : > { %710 = dma.done.wait (%p833_p12), %s234_s7, 128  }
  0x2e   : > { %712 = vsyncadd (%p833_p12), %s234_s7, 4294967168 }
  0x2f   : > { %714 = dma.done.wait (%p43_p1), [#allocation6], 512  }
  0x30   : > { %716 = vsyncadd (%p43_p1), [#allocation6], 4294966784  ;;  %v497_v0 = vld [vmem:[#allocation5 + $0x8] sm:$0xff]  ;;  %v496_v1 = vld [vmem:[#allocation5] sm:$0xff]  ;;  %vm298_vm0 = vcmask 261120   ;;  %s473_s10 = sshll.u32 %s871_s22, 2 }
  0x31   : > { %308 = vmatpush.bf16.msra.mxu0 %v497_v0  ;;  %v276_v2 = vld [vmem:[%s237_s27] sm:$0xff]  ;;  %s493_s11 = sshll.u32 %s795_s25, 2  ;;  %s274_s29 = scalar_lea.vmem [#allocation8], %s473_s10  ;;  %vm355_vm1 = vcmask 257024  }
  0x32   : > { %v277_v3 = vpack.c.bf16 %v276_v2, %v276_v2  ;;  %v499_v4 = vld [vmem:[#allocation7 + $0x8] sm:$0xff]  ;;  %v498_v5 = vld [vmem:[#allocation7] sm:$0xff]  ;;  %s368_s28 = scalar_lea.hbm %s928_s5, %s493_s11  ;;  %s370_s30 = sshll.u32 %s274_s29, 4  ;;  %s371_s30 = int_to_ptr.vmem [resolvable:$true] %s370_s30 }
  0x33   : > { %346 = vmatpush.bf16.msra.mxu1 %v499_v4  ;;  %v569_v6 = vld [vmem:[%s925_s2] ss:$0 sm:$0xff]  ;;  %s372_s16 = sshll.u32 %s368_s28, 4  ;;  %s358_s6 = scalar_lea.sflag [#allocation4], %s871_s22  ;;  %s373_s16 = int_to_ptr.hbm [resolvable:$true] %s372_s16 }
  0x34   : > { %v570_v12 = vld [vmem:[%s927_s4] ss:$0 sm:$0xff]  ;;  %s679_s7 = sshra.s32 %s373_s16, 4  ;;  %s685_s17 = scalar_lea.hbm %s928_s5, 8  ;;  %s680_s7 = int_to_ptr.hbm [resolvable:$true] %s679_s7 }
  0x35   : > { %309 = vmatpush.bf16.msra.mxu0 %v496_v1  ;;  %s681_s25 = scalar_lea.hbm %s680_s7, 4  ;;  %p686_p12 = scmp.lt.s32.totalorder %s680_s7, %s928_s5 }
  0x36   : > { %p682_p1 = scmp.ne.s32.totalorder %s680_s7, %s681_s25  ;;  %p687_p7 = scmp.lt.s32.totalorder %s685_s17, %s681_s25 }
  0x37   : > { %347 = vmatpush.bf16.msra.mxu1 %v498_v5 }
  0x38   : > { %482 = vmatmul.msk.bf16.vlgmr.msra.gmra.mxu0 %vm298_vm0, %v277_v3  ;;  %p683_p3 = pnand %p682_p1, %p840_p4  ;;  %p688_p8 = por %p687_p7, %p686_p12 }
  0x3a   : > { %p684_p5 = pneg %p683_p3 }
  0x3c   : > { %p689_p9 = pnand %p688_p8, %p684_p5 }
  0xb5   : > { %v311_v7 = vpop.f32.mrf.mxu0 }
  0xb6   : > { %v312_v8 = vadd.f32 %v569_v6, %v311_v7 }
  0xb8   : > { %571 = vtanh.f32 %v312_v8 }
  0xbd   : > { %v313_v9 = vpop.f32.mrf.mxu0 }
  0xbe   : > { %v572_v10 = vpop.eup %571 }
  0xbf   : > { %v316_v11 = vpack.c.bf16 %v572_v10, %v572_v10 }
  0xc1   : > { %491 = vmatmul.msk.bf16.vlgmr.msra.gmra.mxu1 %vm298_vm0, %v316_v11 }
 0x13e   : > { %v349_v13 = vpop.f32.mrf.mxu1 }
 0x13f   : > { %v350_v14 = vadd.f32 %v570_v12, %v349_v13 }
 0x141   : > { %573 = vtanh.f32 %v350_v14 }
 0x146   : > { %v351_v15 = vpop.f32.mrf.mxu1 }
 0x147   : > { %v574_v16 = vpop.eup %573 }
 0x148   : > { %v354_v17 = vpack.c.bf16 %v574_v16, %v574_v16 }
 0x14a   : > { %356 = vst.msk [vmem:[%s274_s29] sm:$0xf] %vm355_vm1, %v354_v17 }
 0x14b   : > { %692 = shalt.err (!%p689_p9)
}
 0x14c   : > { %510 = dma.vmem_to_hbm [thread:$0]  (%p840_p4), %s371_s30, 64, %s373_s16, %s358_s6  }
 0x14d PF: > { %s384_s22 = sand.u32 1, %s723_s18   ;;  %p935_p10 = scmp.ge.s32.totalorder %s735_s21, 2 }
 0x14e   : > { %s385_s10 = scalar_lea.sflag [#allocation4], %s384_s22 }
 0x14f   : > { %p524_p13 = pnand %p935_p10, %p844_p6 }
 0x151   : > { %p525_p11 = pneg %p524_p13 }
 0x153   : > { %718 = dma.done.wait (%p525_p11), %s385_s10, 64  }
 0x154   : > { %720 = vsyncadd (%p525_p11), %s385_s10, 4294967232  ;;  %p19_p0 = scmp.ge.s32.totalorder %s814_s12, 4   ;;  %s936_s18 = smov %s727_s19 }
 0x155   : > { %s937_s19 = smov %s731_s20  ;;  %s938_s20 = smov %s825_s15 }
 0x156   : > { %s939_s21 = smov %s814_s12  ;;  %21 = sbr.rel (!%p19_p0) target bundleno = 6 (0x6), region = 93 }
 0x15b   :  { %391 = vsyncpa [#allocation3], 1 }
 0x15c   :  { %393 = vsyncpa [#allocation3 + $0x1], 1 }
 0x15d   :  { %394 = vsyncpa [#allocation6], 1 }
 0x15e   :  { %395 = vsyncpa [#allocation4], 1 }
 0x15f   :  { %397 = vsyncpa [#allocation4 + $0x1], 1 }

</bundles_post_ra>
